<compile_context>
chip_gen: v7x
topology: tpu7x:2x2x1
jax: 0.10.0
libtpu: 0.0.40
codegen_flags: <defaults>
</compile_context>

<pallas_src>
import functools
import math

import jax
import jax.numpy as jnp
from jax.experimental import pallas as pl
from jax.experimental.pallas import tpu as pltpu


def _mha_cross_attn_kernel(x_ref, enc_ref, wq_ref, wk_ref, wv_ref, wo_ref,
                           bo_ref, out_ref, *, num_heads, head_dim):
    # x_ref/enc_ref: (1, S, Dp)    wq/wk/wv_ref: (Dp, Dp)
    # wo_ref: (H, hd, Dp)          bo_ref: (1, Dp) f32     out_ref: (1, S, Dp)
    x = x_ref[0]        # (S, Dp) compute dtype (bf16)
    enc = enc_ref[0]    # (S, Dp)

    # Full-width projections: one MXU matmul each, N = Dp (lane-dense, >=128).
    # 1/sqrt(head_dim) is already folded into wq.
    q = jnp.dot(x, wq_ref[...], preferred_element_type=jnp.float32).astype(x.dtype)
    k = jnp.dot(enc, wk_ref[...], preferred_element_type=jnp.float32).astype(x.dtype)
    v = jnp.dot(enc, wv_ref[...], preferred_element_type=jnp.float32).astype(x.dtype)

    s_rows = x.shape[0]
    d_out = out_ref.shape[-1]
    acc = jnp.zeros((s_rows, d_out), jnp.float32)

    # Fully unrolled head loop (num_heads is a small compile-time constant):
    # per-head scores / softmax / P@V with W_o folded in, accumulated in f32.
    for h in range(num_heads):
        lo = h * head_dim
        q_h = q[:, lo:lo + head_dim]          # (S, hd) static lane slice
        k_h = k[:, lo:lo + head_dim]
        v_h = v[:, lo:lo + head_dim]

        # scores = q_h @ k_h^T without an explicit K transpose through the XLU.
        s = jax.lax.dot_general(q_h, k_h, (((1,), (1,)), ((), ())),
                                preferred_element_type=jnp.float32)      # (S, S)
        s = s - jnp.max(s, axis=-1, keepdims=True)
        p = jnp.exp(s)
        p = p * pl.reciprocal(jnp.sum(p, axis=-1, keepdims=True), approx=True)

        hv = jnp.dot(p.astype(v_h.dtype), v_h,
                     preferred_element_type=jnp.float32).astype(x.dtype)  # (S, hd)
        acc = acc + jnp.dot(hv, wo_ref[h],
                            preferred_element_type=jnp.float32)          # (S, Dp)

    out_ref[0] = (acc + bo_ref[...]).astype(out_ref.dtype)


def pack_mha_weights(w_q, w_kv, w_o, b_o, num_heads, compute_dtype=jnp.bfloat16):
    """Init-time weight packing (do once and cache; not part of the per-call path).

    PyTorch (out, in) layouts: w_q (D, D), w_kv (2D, D), w_o (D, D), b_o (D,).
    Returns lane-padded slabs:
      wq_p, wk_p, wv_p : (Dp, Dp)  columns grouped per head; scale folded into wq
      wo_p             : (H, hd, Dp)
      bo_p             : (1, Dp) float32
    """
    D = w_q.shape[0]
    H = num_heads
    hd = D // H
    Dp = ((D + 127) // 128) * 128
    scale = 1.0 / math.sqrt(hd)

    def pad2(m):  # (D, D) -> (Dp, Dp), zero padded (exact: pads contribute 0)
        return jnp.zeros((Dp, Dp), compute_dtype).at[:D, :D].set(
            m.astype(compute_dtype))

    wq_p = pad2(w_q.T * scale)

    # De-interleave kv: rows of w_kv are ordered (head, {k then v}, head_dim).
    wkv = w_kv.reshape(H, 2, hd, D)
    wk_p = pad2(wkv[:, 0].reshape(D, D).T)
    wv_p = pad2(wkv[:, 1].reshape(D, D).T)

    # W_o^T grouped per head: (H, hd, D) -> pad the output (lane) dim.
    wo_t = w_o.T.reshape(H, hd, D)
    wo_p = jnp.zeros((H, hd, Dp), compute_dtype).at[:, :, :D].set(
        wo_t.astype(compute_dtype))

    bo_p = jnp.zeros((1, Dp), jnp.float32).at[0, :D].set(b_o.astype(jnp.float32))
    return wq_p, wk_p, wv_p, wo_p, bo_p


def _vmem_limit_bytes(S, Dp, num_heads, head_dim, weight_itemsize):
    # Actual buffer math: double-buffered activation tiles, weight slabs
    # (counted twice for safety even though they are fetched once), f32
    # working set; 2x headroom; clamped to per-generation sane bounds
    # (v7x physical VMEM is 64 MiB).
    acts = 3 * 2 * S * Dp * 4
    weights = (2 * (3 * Dp * Dp + num_heads * head_dim * Dp) * weight_itemsize
               + 2 * Dp * 4)
    work = 4 * S * Dp * 4 + 2 * S * S * 4
    est = 2 * (acts + weights + work) + (1 << 20)
    return int(min(max(est, 8 << 20), 64 << 20))


def multihead_cross_attention_packed(x, encoder_out, packed_weights, num_heads):
    """Forward pass using pre-packed weights (see pack_mha_weights)."""
    wq_p, wk_p, wv_p, wo_p, bo_p = packed_weights
    B, S, D = x.shape
    Dp = wq_p.shape[0]
    hd = D // num_heads
    cdt = wq_p.dtype

    xc = x.astype(cdt)
    ec = encoder_out.astype(cdt)
    if Dp != D:  # lane-dense padding of the model dim; no-op when D % 128 == 0
        xc = jnp.pad(xc, ((0, 0), (0, 0), (0, Dp - D)))
        ec = jnp.pad(ec, ((0, 0), (0, 0), (0, Dp - D)))

    kernel = functools.partial(_mha_cross_attn_kernel,
                               num_heads=num_heads, head_dim=hd)

    out = pl.pallas_call(
        kernel,
        out_shape=jax.ShapeDtypeStruct((B, S, Dp), x.dtype),
        grid=(B,),
        in_specs=[
            pl.BlockSpec((1, S, Dp), lambda b: (b, 0, 0)),            # x
            pl.BlockSpec((1, S, Dp), lambda b: (b, 0, 0)),            # encoder_out
            pl.BlockSpec((Dp, Dp), lambda b: (0, 0)),                 # W_q (scaled)
            pl.BlockSpec((Dp, Dp), lambda b: (0, 0)),                 # W_k
            pl.BlockSpec((Dp, Dp), lambda b: (0, 0)),                 # W_v
            pl.BlockSpec((num_heads, hd, Dp), lambda b: (0, 0, 0)),   # W_o per head
            pl.BlockSpec((1, Dp), lambda b: (0, 0)),                  # b_o
        ],
        out_specs=pl.BlockSpec((1, S, Dp), lambda b: (b, 0, 0)),
        compiler_params=pltpu.CompilerParams(
            dimension_semantics=("parallel",),
            vmem_limit_bytes=_vmem_limit_bytes(S, Dp, num_heads, hd,
                                               jnp.dtype(cdt).itemsize),
        ),
    )(xc, ec, wq_p, wk_p, wv_p, wo_p, bo_p)

    return out[..., :D] if Dp != D else out


def multihead_cross_attention(x, encoder_out, w_q, w_kv, w_o, b_o, num_heads,
                              compute_dtype=jnp.bfloat16):
    """Convenience wrapper: packs weights then runs the kernel.  For repeated
    forward calls, pack once with pack_mha_weights (at init) and call
    multihead_cross_attention_packed."""
    packed = pack_mha_weights(w_q, w_kv, w_o, b_o, num_heads, compute_dtype)
    return multihead_cross_attention_packed(x, encoder_out, packed, num_heads)


def _reference(x, encoder_out, w_q, w_kv, w_o, b_o, num_heads):
    """Plain-JAX (f32) reference mirroring the PyTorch forward exactly."""
    B, S, D = x.shape
    hd = D // num_heads
    kv = encoder_out @ w_kv.T                              # (B, S, 2D)
    q = x @ w_q.T                                          # (B, S, D)
    kv = kv.reshape(B, S, num_heads, 2 * hd).transpose(0, 2, 1, 3)
    q = q.reshape(B, S, num_heads, hd).transpose(0, 2, 1, 3)
    k, v = kv[..., :hd], kv[..., hd:]
    scores = jnp.einsum("bhqd,bhkd->bhqk", q, k) / jnp.sqrt(jnp.float32(hd))
    attn = jax.nn.softmax(scores, axis=-1)
    vals = jnp.einsum("bhqk,bhkd->bhqd", attn, v)
    vals = vals.transpose(0, 2, 1, 3).reshape(B, S, D)
    return vals @ w_o.T + b_o


if __name__ == "__main__":
    # Small shapes consistent with the module.
    B, S = 2, 8
    d_model, num_heads = 32, 4

    key = jax.random.PRNGKey(0)
    kx, ke, kq, kkv, kwo, kbo = jax.random.split(key, 6)

    x = jax.random.normal(kx, (B, S, d_model), dtype=jnp.float32)
    encoder_out = jax.random.normal(ke, (B, S, d_model), dtype=jnp.float32)

    # Deterministic parameter init (PyTorch Linear weight layout: (out, in)).
    w_q = jax.random.normal(kq, (d_model, d_model), dtype=jnp.float32) * 0.1
    w_kv = jax.random.normal(kkv, (2 * d_model, d_model), dtype=jnp.float32) * 0.1
    w_o = jax.random.normal(kwo, (d_model, d_model), dtype=jnp.float32) * 0.1
    b_o = jax.random.normal(kbo, (d_model,), dtype=jnp.float32) * 0.1

    # Init-time packing (done once, reused by every forward call).
    packed = jax.block_until_ready(
        pack_mha_weights(w_q, w_kv, w_o, b_o, num_heads))

    out = multihead_cross_attention_packed(x, encoder_out, packed, num_heads)
    out = jax.block_until_ready(out)

    ref = _reference(x, encoder_out, w_q, w_kv, w_o, b_o, num_heads)
    assert out.shape == (B, S, d_model)
    # bf16 MXU operands + approximate reciprocal => loosened tolerance vs f32.
    assert jnp.allclose(out, ref, atol=3e-2, rtol=3e-2), "mismatch vs reference"

    print("KERNEL_OK")
</pallas_src>

<mosaic_0001>
module attributes {stable_mosaic.version = 11 : i64} {
  func.func @_mha_cross_attn_kernel(%arg0: i32, %arg1: memref<1x8x128xbf16, #tpu.memory_space<vmem>>, %arg2: memref<1x8x128xbf16, #tpu.memory_space<vmem>>, %arg3: memref<128x128xbf16, #tpu.memory_space<vmem>>, %arg4: memref<128x128xbf16, #tpu.memory_space<vmem>>, %arg5: memref<128x128xbf16, #tpu.memory_space<vmem>>, %arg6: memref<4x8x128xbf16, #tpu.memory_space<vmem>>, %arg7: memref<1x128xf32, #tpu.memory_space<vmem>>, %arg8: memref<1x8x128xf32, #tpu.memory_space<vmem>>) attributes {dimension_semantics = [#tpu.dimension_semantics<parallel>], iteration_bounds = array<i64: 2>, scalar_prefetch = 0 : i64, scratch_operands = 0 : i64, tpu.core_type = #tpu.core_type<tc>, window_params = [{transform_indices = @transform_0, window_bounds = array<i64: 1, 8, 128>}, {transform_indices = @transform_1, window_bounds = array<i64: 1, 8, 128>}, {pipeline_mode = #tpu.pipeline_mode<synchronous>, transform_indices = @transform_2, window_bounds = array<i64: 128, 128>}, {pipeline_mode = #tpu.pipeline_mode<synchronous>, transform_indices = @transform_3, window_bounds = array<i64: 128, 128>}, {pipeline_mode = #tpu.pipeline_mode<synchronous>, transform_indices = @transform_4, window_bounds = array<i64: 128, 128>}, {pipeline_mode = #tpu.pipeline_mode<synchronous>, transform_indices = @transform_5, window_bounds = array<i64: 4, 8, 128>}, {pipeline_mode = #tpu.pipeline_mode<synchronous>, transform_indices = @transform_6, window_bounds = array<i64: 1, 128>}, {transform_indices = @transform_7, window_bounds = array<i64: 1, 8, 128>}]} {
    %c0 = arith.constant 0 : index
    %c0_0 = arith.constant 0 : index
    %c0_1 = arith.constant 0 : index
    %0 = vector.load %arg1[%c0, %c0_0, %c0_1] : memref<1x8x128xbf16, #tpu.memory_space<vmem>>, vector<1x8x128xbf16>
    %1 = vector.shape_cast %0 : vector<1x8x128xbf16> to vector<8x128xbf16>
    %c0_2 = arith.constant 0 : index
    %c0_3 = arith.constant 0 : index
    %c0_4 = arith.constant 0 : index
    %2 = vector.load %arg2[%c0_2, %c0_3, %c0_4] : memref<1x8x128xbf16, #tpu.memory_space<vmem>>, vector<1x8x128xbf16>
    %3 = vector.shape_cast %2 : vector<1x8x128xbf16> to vector<8x128xbf16>
    %c0_5 = arith.constant 0 : index
    %c0_6 = arith.constant 0 : index
    %4 = vector.load %arg3[%c0_5, %c0_6] : memref<128x128xbf16, #tpu.memory_space<vmem>>, vector<128x128xbf16>
    %cst = arith.constant dense<0.000000e+00> : vector<8x128xf32>
    %5 = tpu.matmul %1, %4, %cst {dimension_numbers = #tpu.dot_dimension_numbers<[1], [0], [0], [1], [0, 0, 1, 1], [], []>} : vector<8x128xbf16>, vector<128x128xbf16>, vector<8x128xf32> -> vector<8x128xf32>
    %6 = arith.truncf %5 : vector<8x128xf32> to vector<8x128xbf16>
    %c0_7 = arith.constant 0 : index
    %c0_8 = arith.constant 0 : index
    %7 = vector.load %arg4[%c0_7, %c0_8] : memref<128x128xbf16, #tpu.memory_space<vmem>>, vector<128x128xbf16>
    %cst_9 = arith.constant dense<0.000000e+00> : vector<8x128xf32>
    %8 = tpu.matmul %3, %7, %cst_9 {dimension_numbers = #tpu.dot_dimension_numbers<[1], [0], [0], [1], [0, 0, 1, 1], [], []>} : vector<8x128xbf16>, vector<128x128xbf16>, vector<8x128xf32> -> vector<8x128xf32>
    %9 = arith.truncf %8 : vector<8x128xf32> to vector<8x128xbf16>
    %c0_10 = arith.constant 0 : index
    %c0_11 = arith.constant 0 : index
    %10 = vector.load %arg5[%c0_10, %c0_11] : memref<128x128xbf16, #tpu.memory_space<vmem>>, vector<128x128xbf16>
    %cst_12 = arith.constant dense<0.000000e+00> : vector<8x128xf32>
    %11 = tpu.matmul %3, %10, %cst_12 {dimension_numbers = #tpu.dot_dimension_numbers<[1], [0], [0], [1], [0, 0, 1, 1], [], []>} : vector<8x128xbf16>, vector<128x128xbf16>, vector<8x128xf32> -> vector<8x128xf32>
    %12 = arith.truncf %11 : vector<8x128xf32> to vector<8x128xbf16>
    %cst_13 = arith.constant 0.000000e+00 : f32
    %13 = vector.broadcast %cst_13 : f32 to vector<8x128xf32>
    %14 = vector.extract_strided_slice %6 {offsets = [0, 0], sizes = [8, 8], strides = [1, 1]} : vector<8x128xbf16> to vector<8x8xbf16>
    %15 = vector.extract_strided_slice %9 {offsets = [0, 0], sizes = [8, 8], strides = [1, 1]} : vector<8x128xbf16> to vector<8x8xbf16>
    %16 = vector.extract_strided_slice %12 {offsets = [0, 0], sizes = [8, 8], strides = [1, 1]} : vector<8x128xbf16> to vector<8x8xbf16>
    %cst_14 = arith.constant dense<0.000000e+00> : vector<8x8xf32>
    %17 = tpu.matmul %14, %15, %cst_14 {dimension_numbers = #tpu.dot_dimension_numbers<[1], [1], [0], [0], [0, 0, 1, 0], [], []>} : vector<8x8xbf16>, vector<8x8xbf16>, vector<8x8xf32> -> vector<8x8xf32>
    %cst_15 = arith.constant dense<0xFF800000> : vector<8xf32>
    %18 = vector.multi_reduction <maximumf>, %17, %cst_15 [1] : vector<8x8xf32> to vector<8xf32>
    %19 = vector.shape_cast %18 : vector<8xf32> to vector<8x1xf32>
    %20 = vector.broadcast %19 : vector<8x1xf32> to vector<8x8xf32>
    %21 = arith.subf %17, %20 : vector<8x8xf32>
    %22 = math.exp %21 : vector<8x8xf32>
    %cst_16 = arith.constant dense<0.000000e+00> : vector<8xf32>
    %23 = vector.multi_reduction <add>, %22, %cst_16 [1] : vector<8x8xf32> to vector<8xf32>
    %24 = vector.shape_cast %23 : vector<8xf32> to vector<8x1xf32>
    %25 = tpu.reciprocal %24 {approx = true} : vector<8x1xf32> -> vector<8x1xf32>
    %26 = vector.broadcast %25 : vector<8x1xf32> to vector<8x8xf32>
    %27 = arith.mulf %22, %26 : vector<8x8xf32>
    %28 = arith.truncf %27 : vector<8x8xf32> to vector<8x8xbf16>
    %cst_17 = arith.constant dense<0.000000e+00> : vector<8x8xf32>
    %29 = tpu.matmul %28, %16, %cst_17 {dimension_numbers = #tpu.dot_dimension_numbers<[1], [0], [0], [1], [0, 0, 1, 1], [], []>} : vector<8x8xbf16>, vector<8x8xbf16>, vector<8x8xf32> -> vector<8x8xf32>
    %30 = arith.truncf %29 : vector<8x8xf32> to vector<8x8xbf16>
    %c0_18 = arith.constant 0 : index
    %c0_19 = arith.constant 0 : index
    %c0_20 = arith.constant 0 : index
    %31 = vector.load %arg6[%c0_18, %c0_19, %c0_20] : memref<4x8x128xbf16, #tpu.memory_space<vmem>>, vector<1x8x128xbf16>
    %32 = vector.shape_cast %31 : vector<1x8x128xbf16> to vector<8x128xbf16>
    %cst_21 = arith.constant dense<0.000000e+00> : vector<8x128xf32>
    %33 = tpu.matmul %30, %32, %cst_21 {dimension_numbers = #tpu.dot_dimension_numbers<[1], [0], [0], [1], [0, 0, 1, 1], [], []>} : vector<8x8xbf16>, vector<8x128xbf16>, vector<8x128xf32> -> vector<8x128xf32>
    %34 = arith.addf %13, %33 : vector<8x128xf32>
    %35 = vector.extract_strided_slice %6 {offsets = [0, 8], sizes = [8, 8], strides = [1, 1]} : vector<8x128xbf16> to vector<8x8xbf16>
    %36 = vector.extract_strided_slice %9 {offsets = [0, 8], sizes = [8, 8], strides = [1, 1]} : vector<8x128xbf16> to vector<8x8xbf16>
    %37 = vector.extract_strided_slice %12 {offsets = [0, 8], sizes = [8, 8], strides = [1, 1]} : vector<8x128xbf16> to vector<8x8xbf16>
    %cst_22 = arith.constant dense<0.000000e+00> : vector<8x8xf32>
    %38 = tpu.matmul %35, %36, %cst_22 {dimension_numbers = #tpu.dot_dimension_numbers<[1], [1], [0], [0], [0, 0, 1, 0], [], []>} : vector<8x8xbf16>, vector<8x8xbf16>, vector<8x8xf32> -> vector<8x8xf32>
    %cst_23 = arith.constant dense<0xFF800000> : vector<8xf32>
    %39 = vector.multi_reduction <maximumf>, %38, %cst_23 [1] : vector<8x8xf32> to vector<8xf32>
    %40 = vector.shape_cast %39 : vector<8xf32> to vector<8x1xf32>
    %41 = vector.broadcast %40 : vector<8x1xf32> to vector<8x8xf32>
    %42 = arith.subf %38, %41 : vector<8x8xf32>
    %43 = math.exp %42 : vector<8x8xf32>
    %cst_24 = arith.constant dense<0.000000e+00> : vector<8xf32>
    %44 = vector.multi_reduction <add>, %43, %cst_24 [1] : vector<8x8xf32> to vector<8xf32>
    %45 = vector.shape_cast %44 : vector<8xf32> to vector<8x1xf32>
    %46 = tpu.reciprocal %45 {approx = true} : vector<8x1xf32> -> vector<8x1xf32>
    %47 = vector.broadcast %46 : vector<8x1xf32> to vector<8x8xf32>
    %48 = arith.mulf %43, %47 : vector<8x8xf32>
    %49 = arith.truncf %48 : vector<8x8xf32> to vector<8x8xbf16>
    %cst_25 = arith.constant dense<0.000000e+00> : vector<8x8xf32>
    %50 = tpu.matmul %49, %37, %cst_25 {dimension_numbers = #tpu.dot_dimension_numbers<[1], [0], [0], [1], [0, 0, 1, 1], [], []>} : vector<8x8xbf16>, vector<8x8xbf16>, vector<8x8xf32> -> vector<8x8xf32>
    %51 = arith.truncf %50 : vector<8x8xf32> to vector<8x8xbf16>
    %c1 = arith.constant 1 : index
    %c0_26 = arith.constant 0 : index
    %c0_27 = arith.constant 0 : index
    %52 = vector.load %arg6[%c1, %c0_26, %c0_27] : memref<4x8x128xbf16, #tpu.memory_space<vmem>>, vector<1x8x128xbf16>
    %53 = vector.shape_cast %52 : vector<1x8x128xbf16> to vector<8x128xbf16>
    %cst_28 = arith.constant dense<0.000000e+00> : vector<8x128xf32>
    %54 = tpu.matmul %51, %53, %cst_28 {dimension_numbers = #tpu.dot_dimension_numbers<[1], [0], [0], [1], [0, 0, 1, 1], [], []>} : vector<8x8xbf16>, vector<8x128xbf16>, vector<8x128xf32> -> vector<8x128xf32>
    %55 = arith.addf %34, %54 : vector<8x128xf32>
    %56 = vector.extract_strided_slice %6 {offsets = [0, 16], sizes = [8, 8], strides = [1, 1]} : vector<8x128xbf16> to vector<8x8xbf16>
    %57 = vector.extract_strided_slice %9 {offsets = [0, 16], sizes = [8, 8], strides = [1, 1]} : vector<8x128xbf16> to vector<8x8xbf16>
    %58 = vector.extract_strided_slice %12 {offsets = [0, 16], sizes = [8, 8], strides = [1, 1]} : vector<8x128xbf16> to vector<8x8xbf16>
    %cst_29 = arith.constant dense<0.000000e+00> : vector<8x8xf32>
    %59 = tpu.matmul %56, %57, %cst_29 {dimension_numbers = #tpu.dot_dimension_numbers<[1], [1], [0], [0], [0, 0, 1, 0], [], []>} : vector<8x8xbf16>, vector<8x8xbf16>, vector<8x8xf32> -> vector<8x8xf32>
    %cst_30 = arith.constant dense<0xFF800000> : vector<8xf32>
    %60 = vector.multi_reduction <maximumf>, %59, %cst_30 [1] : vector<8x8xf32> to vector<8xf32>
    %61 = vector.shape_cast %60 : vector<8xf32> to vector<8x1xf32>
    %62 = vector.broadcast %61 : vector<8x1xf32> to vector<8x8xf32>
    %63 = arith.subf %59, %62 : vector<8x8xf32>
    %64 = math.exp %63 : vector<8x8xf32>
    %cst_31 = arith.constant dense<0.000000e+00> : vector<8xf32>
    %65 = vector.multi_reduction <add>, %64, %cst_31 [1] : vector<8x8xf32> to vector<8xf32>
    %66 = vector.shape_cast %65 : vector<8xf32> to vector<8x1xf32>
    %67 = tpu.reciprocal %66 {approx = true} : vector<8x1xf32> -> vector<8x1xf32>
    %68 = vector.broadcast %67 : vector<8x1xf32> to vector<8x8xf32>
    %69 = arith.mulf %64, %68 : vector<8x8xf32>
    %70 = arith.truncf %69 : vector<8x8xf32> to vector<8x8xbf16>
    %cst_32 = arith.constant dense<0.000000e+00> : vector<8x8xf32>
    %71 = tpu.matmul %70, %58, %cst_32 {dimension_numbers = #tpu.dot_dimension_numbers<[1], [0], [0], [1], [0, 0, 1, 1], [], []>} : vector<8x8xbf16>, vector<8x8xbf16>, vector<8x8xf32> -> vector<8x8xf32>
    %72 = arith.truncf %71 : vector<8x8xf32> to vector<8x8xbf16>
    %c2 = arith.constant 2 : index
    %c0_33 = arith.constant 0 : index
    %c0_34 = arith.constant 0 : index
    %73 = vector.load %arg6[%c2, %c0_33, %c0_34] : memref<4x8x128xbf16, #tpu.memory_space<vmem>>, vector<1x8x128xbf16>
    %74 = vector.shape_cast %73 : vector<1x8x128xbf16> to vector<8x128xbf16>
    %cst_35 = arith.constant dense<0.000000e+00> : vector<8x128xf32>
    %75 = tpu.matmul %72, %74, %cst_35 {dimension_numbers = #tpu.dot_dimension_numbers<[1], [0], [0], [1], [0, 0, 1, 1], [], []>} : vector<8x8xbf16>, vector<8x128xbf16>, vector<8x128xf32> -> vector<8x128xf32>
    %76 = arith.addf %55, %75 : vector<8x128xf32>
    %77 = vector.extract_strided_slice %6 {offsets = [0, 24], sizes = [8, 8], strides = [1, 1]} : vector<8x128xbf16> to vector<8x8xbf16>
    %78 = vector.extract_strided_slice %9 {offsets = [0, 24], sizes = [8, 8], strides = [1, 1]} : vector<8x128xbf16> to vector<8x8xbf16>
    %79 = vector.extract_strided_slice %12 {offsets = [0, 24], sizes = [8, 8], strides = [1, 1]} : vector<8x128xbf16> to vector<8x8xbf16>
    %cst_36 = arith.constant dense<0.000000e+00> : vector<8x8xf32>
    %80 = tpu.matmul %77, %78, %cst_36 {dimension_numbers = #tpu.dot_dimension_numbers<[1], [1], [0], [0], [0, 0, 1, 0], [], []>} : vector<8x8xbf16>, vector<8x8xbf16>, vector<8x8xf32> -> vector<8x8xf32>
    %cst_37 = arith.constant dense<0xFF800000> : vector<8xf32>
    %81 = vector.multi_reduction <maximumf>, %80, %cst_37 [1] : vector<8x8xf32> to vector<8xf32>
    %82 = vector.shape_cast %81 : vector<8xf32> to vector<8x1xf32>
    %83 = vector.broadcast %82 : vector<8x1xf32> to vector<8x8xf32>
    %84 = arith.subf %80, %83 : vector<8x8xf32>
    %85 = math.exp %84 : vector<8x8xf32>
    %cst_38 = arith.constant dense<0.000000e+00> : vector<8xf32>
    %86 = vector.multi_reduction <add>, %85, %cst_38 [1] : vector<8x8xf32> to vector<8xf32>
    %87 = vector.shape_cast %86 : vector<8xf32> to vector<8x1xf32>
    %88 = tpu.reciprocal %87 {approx = true} : vector<8x1xf32> -> vector<8x1xf32>
    %89 = vector.broadcast %88 : vector<8x1xf32> to vector<8x8xf32>
    %90 = arith.mulf %85, %89 : vector<8x8xf32>
    %91 = arith.truncf %90 : vector<8x8xf32> to vector<8x8xbf16>
    %cst_39 = arith.constant dense<0.000000e+00> : vector<8x8xf32>
    %92 = tpu.matmul %91, %79, %cst_39 {dimension_numbers = #tpu.dot_dimension_numbers<[1], [0], [0], [1], [0, 0, 1, 1], [], []>} : vector<8x8xbf16>, vector<8x8xbf16>, vector<8x8xf32> -> vector<8x8xf32>
    %93 = arith.truncf %92 : vector<8x8xf32> to vector<8x8xbf16>
    %c3 = arith.constant 3 : index
    %c0_40 = arith.constant 0 : index
    %c0_41 = arith.constant 0 : index
    %94 = vector.load %arg6[%c3, %c0_40, %c0_41] : memref<4x8x128xbf16, #tpu.memory_space<vmem>>, vector<1x8x128xbf16>
    %95 = vector.shape_cast %94 : vector<1x8x128xbf16> to vector<8x128xbf16>
    %cst_42 = arith.constant dense<0.000000e+00> : vector<8x128xf32>
    %96 = tpu.matmul %93, %95, %cst_42 {dimension_numbers = #tpu.dot_dimension_numbers<[1], [0], [0], [1], [0, 0, 1, 1], [], []>} : vector<8x8xbf16>, vector<8x128xbf16>, vector<8x128xf32> -> vector<8x128xf32>
    %97 = arith.addf %76, %96 : vector<8x128xf32>
    %c0_43 = arith.constant 0 : index
    %c0_44 = arith.constant 0 : index
    %98 = vector.load %arg7[%c0_43, %c0_44] : memref<1x128xf32, #tpu.memory_space<vmem>>, vector<1x128xf32>
    %99 = vector.broadcast %98 : vector<1x128xf32> to vector<8x128xf32>
    %100 = arith.addf %97, %99 : vector<8x128xf32>
    %c0_45 = arith.constant 0 : index
    %c0_46 = arith.constant 0 : index
    %c0_47 = arith.constant 0 : index
    %101 = vector.load %arg8[%c0_45, %c0_46, %c0_47] : memref<1x8x128xf32, #tpu.memory_space<vmem>>, vector<1x8x128xf32>
    %102 = vector.shape_cast %101 : vector<1x8x128xf32> to vector<8x128xf32>
    %103 = vector.shape_cast %100 : vector<8x128xf32> to vector<1x8x128xf32>
    tpu.vector_store %arg8[%c0_45, %c0_46, %c0_47], %103 {strides = array<i32>} : memref<1x8x128xf32, #tpu.memory_space<vmem>>, vector<1x8x128xf32>,
    return
  }
  func.func @transform_0(%arg0: i32) -> (i32, i32, i32) {
    %c0_i32 = arith.constant 0 : i32
    %c0_i32_0 = arith.constant 0 : i32
    %c0_i32_1 = arith.constant 0 : i32
    return %arg0, %c0_i32, %c0_i32_0 : i32, i32, i32
  }
  func.func @transform_1(%arg0: i32) -> (i32, i32, i32) {
    %c0_i32 = arith.constant 0 : i32
    %c0_i32_0 = arith.constant 0 : i32
    %c0_i32_1 = arith.constant 0 : i32
    return %arg0, %c0_i32, %c0_i32_0 : i32, i32, i32
  }
  func.func @transform_2(%arg0: i32) -> (i32, i32) {
    %c0_i32 = arith.constant 0 : i32
    %c0_i32_0 = arith.constant 0 : i32
    %c0_i32_1 = arith.constant 0 : i32
    return %c0_i32, %c0_i32_0 : i32, i32
  }
  func.func @transform_3(%arg0: i32) -> (i32, i32) {
    %c0_i32 = arith.constant 0 : i32
    %c0_i32_0 = arith.constant 0 : i32
    %c0_i32_1 = arith.constant 0 : i32
    return %c0_i32, %c0_i32_0 : i32, i32
  }
  func.func @transform_4(%arg0: i32) -> (i32, i32) {
    %c0_i32 = arith.constant 0 : i32
    %c0_i32_0 = arith.constant 0 : i32
    %c0_i32_1 = arith.constant 0 : i32
    return %c0_i32, %c0_i32_0 : i32, i32
  }
  func.func @transform_5(%arg0: i32) -> (i32, i32, i32) {
    %c0_i32 = arith.constant 0 : i32
    %c0_i32_0 = arith.constant 0 : i32
    %c0_i32_1 = arith.constant 0 : i32
    %c0_i32_2 = arith.constant 0 : i32
    return %c0_i32, %c0_i32_0, %c0_i32_1 : i32, i32, i32
  }
  func.func @transform_6(%arg0: i32) -> (i32, i32) {
    %c0_i32 = arith.constant 0 : i32
    %c0_i32_0 = arith.constant 0 : i32
    %c0_i32_1 = arith.constant 0 : i32
    return %c0_i32, %c0_i32_0 : i32, i32
  }
  func.func @transform_7(%arg0: i32) -> (i32, i32, i32) {
    %c0_i32 = arith.constant 0 : i32
    %c0_i32_0 = arith.constant 0 : i32
    %c0_i32_1 = arith.constant 0 : i32
    return %arg0, %c0_i32, %c0_i32_0 : i32, i32, i32
  }
}

</mosaic_0001>

<bundles_post_ra>
// kernel: tpu_custom_call.1
= control target key start
LH: loop header
LB: loop body
LE: loop exit
PB: predicated region body
PF: predicated region fallthrough
CT: control target
= control target key end

     0   :  { %s2566_s0 = inlined_call_operand.hbm [shape: bf16[2,8,128], index: 0, kind: input, shape index: {}]   ;;  %s2567_s1 = inlined_call_operand.hbm [shape: bf16[2,8,128], index: 1, kind: input, shape index: {}]   ;;  %s2568_s2 = inlined_call_operand.hbm [shape: bf16[128,128], index: 2, kind: input, shape index: {}]   ;;  %s2569_s3 = inlined_call_operand.hbm [shape: bf16[128,128], index: 3, kind: input, shape index: {}]   ;;  %s2570_s4 = inlined_call_operand.hbm [shape: bf16[128,128], index: 4, kind: input, shape index: {}]   ;;  %s2571_s5 = inlined_call_operand.vmem [shape: bf16[4,8,128], index: 5, kind: input, shape index: {}]   ;;  %s2572_s6 = inlined_call_operand.vmem [shape: f32[1,128], index: 6, kind: input, shape index: {}]   ;;  %s2573_s7 = inlined_call_operand.hbm [shape: f32[2,8,128], index: 7, kind: output, shape index: {}]  }
   0x1   :  { %2579 = sst [smem:[#allocation18_spill]] %s2568_s2 }
   0x2   :  { %2580 = sst [smem:[#allocation19_spill]] %s2569_s3 }
   0x3   :  { %2581 = sst [smem:[#allocation20_spill]] %s2570_s4 }
   0x4   :  { %12 = vsyncpa [#allocation3], 0 }
   0x5   :  { %14 = vsyncpa [#allocation3 + $0x1], 0 }
   0x6   :  { %15 = vsyncpa [#allocation6], 0 }
   0x7   :  { %17 = vsyncpa [#allocation6 + $0x1], 0 }
   0x8   :  { %18 = vsyncpa [#allocation9], 0 }
   0x9   :  { %19 = vsyncpa [#allocation4], 0 }
   0xa   :  { %21 = vsyncpa [#allocation4 + $0x1], 0  ;;  %s2122_s24 = smov 0   ;;  %s2124_s25 = smov 0  }
   0xb   :  { %s2126_s26 = smov 0   ;;  %s2128_s27 = smov 0  }
   0xc LB: > { %s2143_s28 = sadd.s32 4294967295, %s2067_s27   ;;  %s1472_s29 = sadd.s32 4294967294, %s2067_s27   ;;  %s2067_s27 = sphi %s2128_s27, %s2607_s27   ;;  %s2063_s26 = sphi %s2126_s26, %s2606_s26   ;;  %s2059_s25 = sphi %s2124_s25, %s2605_s25   ;;  %s2055_s24 = sphi %s2122_s24, %s2604_s24  }
   0xd   : > { %p47_p0 = scmp.ne.s32.totalorder %s2059_s25, %s2055_s24  ;;  %p2574_p1 = scmp.eq.s32.totalorder %s2143_s28, 0 }
   0xe   : > { %p208_p3 = scmp.eq.s32.totalorder %s1472_s29, 1  ;;  %p1473_p5 = scmp.ge.s32.totalorder %s2067_s27, 1 }
   0xf   : > { %p2152_p4 = por %p2574_p1, %p47_p0  ;;  %p215_p7 = scmp.lt.s32.totalorder %s2067_s27, 3 }
  0x10   : > { %p2157_p6 = por %p208_p3, %p47_p0  ;;  %s2069_s10 = smov [#allocation7]  }
  0x11   : > { %s2582_s30 = scalar_select %p2152_p4, 1, 0 }
  0x12   : > { %s2583_s8 = scalar_select %p2157_p6, 1, 0 }
  0x13   : > { %p2162_p8 = pnand %p1473_p5, %p215_p7  ;;  %s227_s11 = sshll.u32 %s2069_s10, 4  ;;  %s2166_s11 = int_to_ptr.vmem [resolvable:$true] %s227_s11 }
  0x14   : > { %2584 = sst [smem:[#allocation17_spill]] %s2583_s8  ;;  %s2070_s13 = smov [#allocation8]  }
  0x15   : > { %s2585_s9 = scalar_select %p2162_p8, 1, 0 }
  0x16   : > { %p1734_p9 = pneg %p2162_p8  ;;  %s240_s14 = sshll.u32 %s2070_s13, 4  ;;  %s2177_s14 = int_to_ptr.vmem [resolvable:$true] %s240_s14 }
  0x17   : > { %s2071_s15 = smov [#allocation10]   ;;  %s2587_s2 = sld [smem:[#allocation18_spill]] }
  0x18   : > { %p2173_p11 = pnand %p1734_p9, %p2574_p1  ;;  %s2179_s16 = sshll.u32 %s2071_s15, 4  ;;  %s254_s16 = int_to_ptr.vmem [resolvable:$true] %s2179_s16 }
  0x1a   : > { %p2189_p13 = pneg %p2173_p11 }
  0x1d   : > { %s1845_s19 = scalar_lea.hbm %s2587_s2, 1024 }
  0x1e   : > { %p1846_p12 = scmp.ne.s32.totalorder %s2587_s2, %s1845_s19  ;;  %p1852_p5 = scmp.lt.u32.totalorder %s1845_s19, %s2587_s2 }
  0x20   : > { %p1848_p0 = pnand %p2189_p13, %p1846_p12 }
  0x22   : > { %p1849_p3 = pneg %p1848_p0 }
  0x24   : > { %p1854_p7 = pnand %p1852_p5, %p1849_p3 }
  0x26   : > { %1857 = shalt.err (!%p1854_p7)
}
  0x27   : > { %s1858_s10 = scalar_lea.vmem %s2166_s11, 1024  ;;  %p1866_p2 = scmp.lt.s32.totalorder %s2166_s11, %s2166_s11 }
  0x28   : > { %p1859_p9 = scmp.ne.s32.totalorder %s2166_s11, %s1858_s10  ;;  %p1867_p6 = scmp.lt.s32.totalorder %s1858_s10, %s1858_s10 }
  0x2a   : > { %p1861_p10 = pnand %p1859_p9, %p2189_p13  ;;  %p1868_p12 = por %p1867_p6, %p1866_p2 }
  0x2c   : > { %p1862_p1 = pneg %p1861_p10 }
  0x2e   : > { %p1869_p0 = pnand %p1868_p12, %p1862_p1 }
  0x30   : > { %1872 = shalt.err (!%p1869_p0)
}
  0x31   : > { %s2072_s13 = smov 64   ;;  %s2073_s15 = smov 4  }
  0x32   : > { %1737 = dma.hbm_to_vmem [thread:$0]  (!%p2173_p11), %s2587_s2, 1024, %s2166_s11, [#allocation6], %s2072_s13, %s2072_s13, %s2073_s15  }
  0x33   : > { %s2589_s3 = sld [smem:[#allocation19_spill]] }
  0x39   : > { %s1873_s21 = scalar_lea.hbm %s2589_s3, 1024 }
  0x3a   : > { %p1874_p1 = scmp.ne.s32.totalorder %s2589_s3, %s1873_s21  ;;  %p1880_p10 = scmp.lt.u32.totalorder %s1873_s21, %s2589_s3 }
  0x3c   : > { %p1876_p2 = pnand %p1874_p1, %p2189_p13 }
  0x3e   : > { %p1877_p6 = pneg %p1876_p2 }
  0x40   : > { %p1882_p3 = pnand %p1880_p10, %p1877_p6 }
  0x42   : > { %1885 = shalt.err (!%p1882_p3)
}
  0x43   : > { %s1886_s11 = scalar_lea.vmem %s2177_s14, 1024  ;;  %p1894_p12 = scmp.lt.s32.totalorder %s2177_s14, %s2177_s14 }
  0x44   : > { %p1887_p5 = scmp.ne.s32.totalorder %s2177_s14, %s1886_s11  ;;  %p1895_p0 = scmp.lt.s32.totalorder %s1886_s11, %s1886_s11 }
  0x46   : > { %p1889_p7 = pnand %p1887_p5, %p2189_p13  ;;  %p1896_p1 = por %p1895_p0, %p1894_p12 }
  0x48   : > { %p1890_p9 = pneg %p1889_p7 }
  0x4a   : > { %p1897_p2 = pnand %p1896_p1, %p1890_p9 }
  0x4c   : > { %1900 = shalt.err (!%p1897_p2)
}
  0x4d   : > { %1740 = dma.hbm_to_vmem [thread:$0]  (!%p2173_p11), %s2589_s3, 1024, %s2177_s14, [#allocation9], %s2072_s13, %s2072_s13, %s2073_s15  }
  0x4e   : > { %s2590_s4 = sld [smem:[#allocation20_spill]] }
  0x54   : > { %s1901_s20 = scalar_lea.hbm %s2590_s4, 1024 }
  0x55   : > { %p1902_p6 = scmp.ne.s32.totalorder %s2590_s4, %s1901_s20  ;;  %p1908_p5 = scmp.lt.u32.totalorder %s1901_s20, %s2590_s4 }
  0x57   : > { %p1904_p10 = pnand %p1902_p6, %p2189_p13 }
  0x59   : > { %p1905_p3 = pneg %p1904_p10 }
  0x5b   : > { %p1910_p7 = pnand %p1908_p5, %p1905_p3 }
  0x5d   : > { %1913 = shalt.err (!%p1910_p7)
}
  0x5e   : > { %s1914_s11 = scalar_lea.vmem %s254_s16, 1024  ;;  %p1922_p1 = scmp.lt.s32.totalorder %s254_s16, %s254_s16 }
  0x5f   : > { %p1915_p9 = scmp.ne.s32.totalorder %s254_s16, %s1914_s11  ;;  %p1923_p2 = scmp.lt.s32.totalorder %s1914_s11, %s1914_s11 }
  0x61   : > { %p1917_p12 = pnand %p1915_p9, %p2189_p13  ;;  %p1924_p4 = por %p1923_p2, %p1922_p1 }
  0x63   : > { %p1918_p0 = pneg %p1917_p12 }
  0x65   : > { %p1925_p8 = pnand %p1924_p4, %p1918_p0 }
  0x67   : > { %1928 = shalt.err (!%p1925_p8)
}
  0x68   : > { %1743 = dma.hbm_to_vmem [thread:$0]  (!%p2173_p11), %s2590_s4, 1024, %s254_s16, [#allocation9], %s2072_s13, %s2072_s13, %s2073_s15  }
  0x69   : > { %s2262_s22 = sadd.s32 1, %s2067_s27   ;;  %s34_s17 = sadd.s32 1, %s2063_s26 }
  0x6a   : > { %s31_s12 = ssub.s32 %s2067_s27, %s2262_s22  ;;  %p41_p8 = scmp.ne.s32.totalorder %s2063_s26, %s2059_s25 }
  0x6b   : > { %p32_p4 = scmp.eq.s32.totalorder %s31_s12, 0  ;;  %p42_p13 = scmp.eq.s32.totalorder %s2067_s27, 0 }
  0x6c   : > { %p1758_p6 = scmp.lt.s32.totalorder %s2067_s27, 2  ;;  %p2591_p3 = scmp.eq.s32.totalorder %s2143_s28, 1 }
  0x6d   : > { %s2272_s18 = scalar_select %p32_p4, %s2063_s26, %s34_s17  }
  0x6e   : > { %p43_p10 = por %p42_p13, %p41_p8  ;;  %p2276_p5 = por %p2591_p3, %p41_p8 }
  0x6f   : > { %s273_s20 = sand.u32 1, %s2063_s26   ;;  %s1479_s21 = sshll.u32 %s2067_s27, 6 }
  0x70   : > { %s2592_s19 = scalar_select %p2276_p5, 1, 0 }
  0x71   : > { %s2282_s16 = sshll.u32 %s273_s20, 2  ;;  %s2287_s23 = scalar_lea.hbm %s2566_s0, %s1479_s21 }
  0x72   : > { %s277_s29 = scalar_lea.vmem [#allocation2], %s2282_s16  ;;  %p2290_p11 = pnand %p1758_p6, %p43_p10 }
  0x73   : > { %s284_s10 = sshll.u32 %s277_s29, 4  ;;  %s2299_s12 = scalar_lea.hbm %s2567_s1, %s1479_s21  ;;  %s2294_s10 = int_to_ptr.vmem [resolvable:$true] %s284_s10 }
  0x74   : > { %s274_s17 = scalar_lea.sflag [#allocation3], %s273_s20  ;;  %s1929_s13 = scalar_lea.hbm %s2287_s23, 64 }
  0x75   : > { %p1930_p7 = scmp.ne.s32.totalorder %s2287_s23, %s1929_s13  ;;  %p1931_p9 = pneg %p2290_p11 }
  0x76   : > { %s1934_s2 = scalar_lea.hbm %s2566_s0, 128  ;;  %p1935_p1 = scmp.lt.u32.totalorder %s2287_s23, %s2566_s0 }
  0x77   : > { %p1932_p12 = pnand %p1931_p9, %p1930_p7  ;;  %p1936_p2 = scmp.lt.u32.totalorder %s1934_s2, %s1929_s13 }
  0x78   : > { %p1938_p8 = scmp.lt.u32.totalorder %s1929_s13, %s2287_s23 }
  0x79   : > { %p1933_p0 = pneg %p1932_p12  ;;  %p1937_p4 = por %p1936_p2, %p1935_p1 }
  0x7b   : > { %p1939_p13 = por %p1938_p8, %p1937_p4 }
  0x7d   : > { %p1940_p6 = pnand %p1939_p13, %p1933_p0 }
  0x7f   : > { %1943 = shalt.err (!%p1940_p6)
}
  0x80   : > { %s1944_s20 = scalar_lea.vmem %s2294_s10, 64  ;;  %s2074_s21 = smov [#allocation2]  }
  0x81   : > { %p1945_p10 = scmp.ne.s32.totalorder %s2294_s10, %s1944_s20  ;;  %s1949_s14 = sshll.u32 %s2074_s21, 4  ;;  %s1950_s14 = int_to_ptr.vmem [resolvable:$false] %s1949_s14 }
  0x82   : > { %s1951_s3 = scalar_lea.vmem %s1950_s14, 128  ;;  %p1952_p12 = scmp.lt.s32.totalorder %s2294_s10, %s1950_s14 }
  0x83   : > { %p1947_p3 = pnand %p1945_p10, %p1931_p9  ;;  %p1953_p1 = scmp.lt.s32.totalorder %s1951_s3, %s1944_s20 }
  0x85   : > { %p1948_p7 = pneg %p1947_p3  ;;  %p1954_p2 = por %p1953_p1, %p1952_p12 }
  0x87   : > { %p1955_p4 = pnand %p1954_p2, %p1948_p7 }
  0x89   : > { %1958 = shalt.err (!%p1955_p4)
}
  0x8a   : > { %1747 = dma.hbm_to_vmem [thread:$0]  (!%p2290_p11), %s2287_s23, 64, %s2294_s10, %s274_s17  }
  0x8b   : > { %s291_s2 = sand.u32 1, %s2067_s27   ;;  %s295_s4 = scalar_lea.vmem [#allocation5], %s2282_s16 }
  0x8c   : > { %s302_s8 = sshll.u32 %s295_s4, 4  ;;  %s292_s13 = scalar_lea.sflag [#allocation6], %s291_s2  ;;  %s303_s8 = int_to_ptr.vmem [resolvable:$true] %s302_s8 }
  0x8d   : > { %s1959_s15 = scalar_lea.hbm %s2299_s12, 64  ;;  %s1964_s21 = scalar_lea.hbm %s2567_s1, 128 }
  0x8e   : > { %p1960_p0 = scmp.ne.s32.totalorder %s2299_s12, %s1959_s15  ;;  %p1965_p6 = scmp.lt.u32.totalorder %s2299_s12, %s2567_s1 }
  0x8f   : > { %p1966_p10 = scmp.lt.u32.totalorder %s1964_s21, %s1959_s15  ;;  %p1968_p7 = scmp.lt.u32.totalorder %s1959_s15, %s2299_s12 }
  0x90   : > { %p1962_p8 = pnand %p1960_p0, %p1931_p9 }
  0x91   : > { %p1967_p3 = por %p1966_p10, %p1965_p6 }
  0x92   : > { %p1963_p13 = pneg %p1962_p8 }
  0x93   : > { %p1969_p12 = por %p1968_p7, %p1967_p3 }
  0x95   : > { %p1970_p1 = pnand %p1969_p12, %p1963_p13 }
  0x97   : > { %1973 = shalt.err (!%p1970_p1)
}
  0x98   : > { %s1974_s16 = scalar_lea.vmem %s303_s8, 64  ;;  %s2075_s23 = smov [#allocation5]  }
  0x99   : > { %p1975_p2 = scmp.ne.s32.totalorder %s303_s8, %s1974_s16  ;;  %s1979_s10 = sshll.u32 %s2075_s23, 4  ;;  %s1980_s10 = int_to_ptr.vmem [resolvable:$false] %s1979_s10 }
  0x9a   : > { %s1981_s17 = scalar_lea.vmem %s1980_s10, 128  ;;  %p1982_p8 = scmp.lt.s32.totalorder %s303_s8, %s1980_s10 }
  0x9b   : > { %p1977_p4 = pnand %p1975_p2, %p1931_p9  ;;  %p1983_p5 = scmp.lt.s32.totalorder %s1981_s17, %s1974_s16 }
  0x9d   : > { %p1978_p0 = pneg %p1977_p4  ;;  %p1984_p6 = por %p1983_p5, %p1982_p8 }
  0x9f   : > { %p1985_p10 = pnand %p1984_p6, %p1978_p0 }
  0xa1   : > { %1988 = shalt.err (!%p1985_p10)
}
  0xa2   : > { %1750 = dma.hbm_to_vmem [thread:$0]  (!%p2290_p11), %s2299_s12, 64, %s303_s8, %s292_s13  }
  0xa3   : > { %p2594_p13 = scmp.ne.s32.totalorder %s2585_s9, 0 }
  0xa4   : > { %s2350_s2 = sand.u32 (!%p2594_p13), 1, %s2059_s25   ;;  %p2595_p5 = scmp.ne.s32.totalorder (!%p2594_p13), %s2582_s30, 0 }
  0xa5   : > { %311 = sbr.rel (%p2594_p13) target bundleno = 3233 (0xca1), region = 48  ;;  %s1483_s4 = sshll.u32 (!%p2594_p13), %s2350_s2, 2 }
  0xa6   : > { %s314_s15 = scalar_lea.sflag (!%p2594_p13), [#allocation3], %s2350_s2  ;;  %s2354_s29 = scalar_lea.vmem (!%p2594_p13), [#allocation2], %s1483_s4 }
  0xac   : > { %2034 = dma.done.wait (%p2595_p5), %s314_s15, 64  }
  0xad   : > { %2036 = vsyncadd (%p2595_p5), %s314_s15, 4294967232  ;;  %s322_s11 = sand.u32 1, %s2143_s28   ;;  %s2361_s12 = scalar_lea.vmem [#allocation5], %s1483_s4 }
  0xae   : > { %s323_s9 = scalar_lea.sflag [#allocation6], %s322_s11 }
  0xaf   : > { %2038 = dma.done.wait (%p2595_p5), %s323_s9, 64  }
  0xb0   : > { %2040 = vsyncadd (%p2595_p5), %s323_s9, 4294967232  ;;  %p2596_p11 = scmp.eq.s32.totalorder %s2143_s28, 0 }
  0xb2   : > { %2042 = dma.done.wait (%p2596_p11), [#allocation6], 1024   ;;  %p2597_p9 = pmov %p2596_p11 }
  0xb4   : > { %2044 = vsyncadd (%p2597_p9), [#allocation6], 4294966272  ;;  %p2598_p3 = pmov %p2597_p9 }
  0xb6   : > { %2046 = dma.done.wait (%p2598_p3), [#allocation9], 2048   ;;  %p2599_p7 = pmov %p2598_p3 }
  0xb7   : > { %v2076_v0 = vmov 0.0   ;;  %vm2077_vm0 = vmmov 0   ;;  %v1805_v1 = vld [vmem:[#allocation8] sm:$0xff]   ;;  %v1806_v2 = vld [vmem:[#allocation8 + $0x8] sm:$0xff]   ;;  %v1808_v5 = vld [vmem:[#allocation8 + $0x10] sm:$0xff]   ;;  %vm692_vm1 = vcmask 64512  }
  0xb8   : > { %2048 = vsyncadd (%p2599_p7), [#allocation9], 4294965248  ;;  %1604 = vmatprep.subr.bf16.mxu1 %v2076_v0  ;;  %1584 = vmatprep.subr.bf16.mxu0 %v2076_v0  ;;  %v1807_v3 = vld [vmem:[#allocation7] sm:$0xff]   ;;  %v1809_v4 = vld [vmem:[#allocation7 + $0x8] sm:$0xff]   ;;  %s2078_s30 = smov 120   ;;  %vm754_vm2 = vcmask 1043456  }
  0xb9   : > { %1620 = vmatprep.mubr.msk.bf16.mxu1 %vm2077_vm0, %v2076_v0  ;;  %1600 = vmatprep.mubr.msk.bf16.mxu0 %vm2077_vm0, %v2076_v0  ;;  %v1811_v6 = vld [vmem:[#allocation7 + $0x10] sm:$0xff]   ;;  %v1810_v7 = vld [vmem:[#allocation8 + $0x18] sm:$0xff]   ;;  %v1812_v9 = vld [vmem:[#allocation8 + $0x20] sm:$0xff]   ;;  %s2079_s8 = smov 112   ;;  %s2080_s3 = smov 104  }
  0xba   : > { %1605 = vmatpush3.bf16.msra.mxu1 %v1805_v1  ;;  %1585 = vmatpush3.bf16.msra.mxu0 %v1807_v3  ;;  %v1813_v8 = vld [vmem:[#allocation7 + $0x18] sm:$0xff]   ;;  %v1814_v10 = vld [vmem:[#allocation8 + $0x28] sm:$0xff]   ;;  %v1815_v11 = vld [vmem:[#allocation7 + $0x20] sm:$0xff]   ;;  %s1488_s4 = sshll.u32 %s2350_s2, 3  ;;  %s1530_s11 = sshll.u32 %s2143_s28, 7 }
  0xbb   : > { %1606 = vmatprep.subr.bf16.mxu1 %v2076_v0  ;;  %1586 = vmatprep.subr.bf16.mxu0 %v2076_v0  ;;  %v1817_v12 = vld [vmem:[#allocation7 + $0x28] sm:$0xff]   ;;  %v1816_v13 = vld [vmem:[#allocation8 + $0x30] sm:$0xff]   ;;  %v1818_v15 = vld [vmem:[#allocation8 + $0x38] sm:$0xff]   ;;  %s373_s9 = scalar_lea.vmem [#allocation11], %s1488_s4  ;;  %s2522_s13 = scalar_lea.hbm %s2573_s7, %s1530_s11 }
  0xbc   : > { %v1819_v14 = vld [vmem:[#allocation7 + $0x30] sm:$0xff]   ;;  %v1820_v16 = vld [vmem:[#allocation7 + $0x38] sm:$0xff]   ;;  %v1821_v30 = vld [vmem:[#allocation10] sm:$0xff]   ;;  %s1338_s20 = scalar_lea.sflag [#allocation4], %s2350_s2  ;;  %p2600_p1 = scmp.ne.s32.totalorder %s2592_s19, 0 }
  0xbd   : > { %v376_v17 = vld [vmem:[%s2361_s12] sm:$0xf]  ;;  %v375_v18 = vld [vmem:[%s2354_s29] sm:$0xf]  ;;  %v1822_v31 = vld [vmem:[#allocation10 + $0x8] sm:$0xff]   ;;  %s1351_s12 = sshll.u32 %s373_s9, 4  ;;  %s2524_s12 = int_to_ptr.vmem [resolvable:$true] %s1351_s12 }
  0xbe   : > { %1607 = vmatpush3.bf16.msra.mxu1 %v1806_v2  ;;  %1587 = vmatpush3.bf16.msra.mxu0 %v1809_v4  ;;  %v1823_v32 = vld [vmem:[#allocation10 + $0x10] sm:$0xff]   ;;  %v1824_v33 = vld [vmem:[#allocation10 + $0x18] sm:$0xff]   ;;  %v1825_v34 = vld [vmem:[#allocation10 + $0x20] sm:$0xff]   ;;  %s1989_s28 = scalar_lea.vmem %s2524_s12, 128  ;;  %s2081_s21 = smov [#allocation11]  }
  0xbf   : > { %1608 = vmatprep.subr.bf16.mxu1 %v2076_v0  ;;  %1588 = vmatprep.subr.bf16.mxu0 %v2076_v0  ;;  %v1826_v35 = vld [vmem:[#allocation10 + $0x28] sm:$0xff]   ;;  %v1827_v36 = vld [vmem:[#allocation10 + $0x30] sm:$0xff]   ;;  %v1828_v37 = vld [vmem:[#allocation10 + $0x38] sm:$0xff]   ;;  %p1990_p12 = scmp.ne.s32.totalorder %s2524_s12, %s1989_s28  ;;  %s1993_s14 = sshll.u32 %s2081_s21, 4  ;;  %s1994_s14 = int_to_ptr.vmem [resolvable:$false] %s1993_s14 }
  0xc0   : > { %p1996_p0 = scmp.lt.s32.totalorder %s2524_s12, %s1994_s14 }
  0xc1   : > { %p1991_p2 = pnand %p1990_p12, %p2600_p1 }
  0xc2   : > { %1609 = vmatpush3.bf16.msra.mxu1 %v1808_v5  ;;  %1589 = vmatpush3.bf16.msra.mxu0 %v1811_v6 }
  0xc3   : > { %1610 = vmatprep.subr.bf16.mxu1 %v2076_v0  ;;  %1590 = vmatprep.subr.bf16.mxu0 %v2076_v0  ;;  %p1992_p4 = pneg %p1991_p2 }
  0xc6   : > { %1611 = vmatpush3.bf16.msra.mxu1 %v1810_v7  ;;  %1591 = vmatpush3.bf16.msra.mxu0 %v1813_v8 }
  0xc7   : > { %1612 = vmatprep.subr.bf16.mxu1 %v2076_v0  ;;  %1592 = vmatprep.subr.bf16.mxu0 %v2076_v0 }
  0xca   : > { %1613 = vmatpush3.bf16.msra.mxu1 %v1812_v9  ;;  %1593 = vmatpush3.bf16.msra.mxu0 %v1815_v11 }
  0xcb   : > { %1614 = vmatprep.subr.bf16.mxu1 %v2076_v0  ;;  %1594 = vmatprep.subr.bf16.mxu0 %v2076_v0 }
  0xce   : > { %1615 = vmatpush3.bf16.msra.mxu1 %v1814_v10  ;;  %1595 = vmatpush3.bf16.msra.mxu0 %v1817_v12 }
  0xcf   : > { %1616 = vmatprep.subr.bf16.mxu1 %v2076_v0  ;;  %1596 = vmatprep.subr.bf16.mxu0 %v2076_v0 }
  0xd2   : > { %1617 = vmatpush3.bf16.msra.mxu1 %v1816_v13  ;;  %1597 = vmatpush3.bf16.msra.mxu0 %v1819_v14  ;;  %v1517_v14 = vld [vmem:[%s2571_s5 + $0x4] sm:$0xf] }
  0xd3   : > { %1618 = vmatprep.subr.bf16.mxu1 %v2076_v0  ;;  %1598 = vmatprep.subr.bf16.mxu0 %v2076_v0 }
  0xd6   : > { %1619 = vmatpush3.bf16.msra.mxu1 %v1818_v15  ;;  %1599 = vmatpush3.bf16.msra.mxu0 %v1820_v16  ;;  %v920_v15 = vsel %vm754_vm2, %v1517_v14, 0 }
  0xd7   : > { %1644 = vmatprep.subr.bf16.mxu1 %v2076_v0  ;;  %1624 = vmatprep.subr.bf16.mxu0 %v2076_v0 }
  0xd9   : > { %1621 = vmatmul.mubr.bf16.vlgmr.msra.gmra.mrb[0].mxu1 %v376_v17  ;;  %1601 = vmatmul.mubr.bf16.vlgmr.msra.gmra.mrb[0].mxu0 %v375_v18  ;;  %v799_v18 = vld [vmem:[%s2571_s5] sm:$0xf] }
  0xda   : > { %1646 = vmatprep.mubr.msk.bf16.mxu1 %vm2077_vm0, %v2076_v0  ;;  %1640 = vmatprep.mubr.msk.bf16.mxu0 %vm2077_vm0, %v2076_v0 }
  0xdb   : > { %1625 = vmatpush3.bf16.msra.mxu0 %v1821_v30 }
  0xdc   : > { %1626 = vmatprep.subr.bf16.mxu0 %v2076_v0 }
  0xdf   : > { %1627 = vmatpush3.bf16.msra.mxu0 %v1822_v31 }
  0xe0   : > { %1628 = vmatprep.subr.bf16.mxu0 %v2076_v0 }
  0xe3   : > { %1629 = vmatpush3.bf16.msra.mxu0 %v1823_v32 }
  0xe4   : > { %1630 = vmatprep.subr.bf16.mxu0 %v2076_v0 }
  0xe7   : > { %1631 = vmatpush3.bf16.msra.mxu0 %v1824_v33 }
  0xe8   : > { %1632 = vmatprep.subr.bf16.mxu0 %v2076_v0 }
  0xeb   : > { %1633 = vmatpush3.bf16.msra.mxu0 %v1825_v34 }
  0xec   : > { %1634 = vmatprep.subr.bf16.mxu0 %v2076_v0 }
  0xef   : > { %1635 = vmatpush3.bf16.msra.mxu0 %v1826_v35 }
  0xf0   : > { %1636 = vmatprep.subr.bf16.mxu0 %v2076_v0 }
  0xf3   : > { %1637 = vmatpush3.bf16.msra.mxu0 %v1827_v36 }
  0xf4   : > { %1638 = vmatprep.subr.bf16.mxu0 %v2076_v0 }
  0xf7   : > { %1639 = vmatpush3.bf16.msra.mxu0 %v1828_v37 }
  0xf8   : > { %1668 = vmatprep.subr.bf16.mxu0 %v2076_v0 }
  0xfa   : > { %1641 = vmatmul.mubr.bf16.vlgmr.msra.gmra.mrb[4].mxu0 %v376_v17 }
  0xfb   : > { %1670 = vmatprep.mubr.msk.bf16.mxu0 %vm2077_vm0, %v2076_v0  ;;  %1669 = vmatpush3.bf16.msra.mxu0 %v920_v15  ;;  %v1526_v15 = vld [vmem:[%s2571_s5 + $0xc] sm:$0xf] }
  0xfc   : > { %1680 = vmatprep.subr.bf16.mxu0 %v2076_v0 }
 0x1ac   : > { %v580_v19 = vpop.f32.mrb[0].mxu1  ;;  %v475_v23 = vpop.f32.mrb[0].mxu0 }
 0x1ad   : > { %v2403_v20 = vpack.c.bf16 %v580_v19, %v580_v19  ;;  %v1622_v21 = vpop.f32.mrb[1].mxu1  ;;  %v2409_v26 = vpack.c.bf16 %v475_v23, %v475_v23  ;;  %v1602_v27 = vpop.f32.mrb[1].mxu0 }
 0x1ae   : > { %v583_v22 = vpop.f32.mrb[2].mxu1  ;;  %v478_v28 = vpop.f32.mrb[2].mxu0 }
 0x1af   : > { %804 = vrot.lane.b32.xlu1 %v2403_v20, %s2078_s30  ;;  %v1623_v24 = vpop.f32.mrb[3].mxu1  ;;  %v697_v25 = vsel %vm692_vm1, %v2403_v20, 0  ;;  %v1603_v29 = vpop.f32.mrb[3].mxu0  ;;  %v966_v22 = vsel %vm754_vm2, %v799_v18, 0 }
 0x1b0   : > { %1645 = vmatpush3.bf16.xpose.msra.mxu1 %v697_v25 }
 0x1b1   : > { %1650 = vmatprep.subr.bf16.mxu1 %v2076_v0 }
 0x1b3   : > { %801 = vrot.lane.b32.xlu1 %v2409_v26, %s2078_s30 }
 0x1b7   : > { %1647 = vmatmul.mubr.msk.bf16.vlgmr.msra.gmra.mrb[4].mxu1 %vm692_vm1, %v2409_v26 }
 0x1b8   : > { %1652 = vmatprep.mubr.msk.bf16.mxu1 %vm2077_vm0, %v2076_v0 }
 0x1cd   : > { %v685_v48 = vpop.f32.mrb[4].mxu0 }
 0x1ce   : > { %v1642_v49 = vpop.f32.mrb[5].mxu0  ;;  %v2430_v51 = vpack.c.bf16 %v685_v48, %v685_v48 }
 0x1cf   : > { %v688_v50 = vpop.f32.mrb[6].mxu0 }
 0x1d0   : > { %v1643_v52 = vpop.f32.mrb[7].mxu0  ;;  %v756_v53 = vsel %vm754_vm2, %v2430_v51, 0 }
 0x1d1   : > { %1651 = vmatpush3.bf16.msra.mxu1 %v756_v53 }
 0x1d2   : > { %1656 = vmatprep.subr.bf16.mxu1 %v2076_v0 }
 0x221   : > { %v805_v57 = vpop.permute.xlu1 %804 }
 0x222   : > { %v810_v59 = vsel %vm692_vm1, %v805_v57, 0 }
 0x225   : > { %v802_v60 = vpop.permute.xlu1 %801 }
 0x28a   : > { %v733_v38 = vpop.f32.mrb[4].mxu1 }
 0x28b   : > { %v1648_v39 = vpop.f32.mrb[5].mxu1  ;;  %v739_v40 = vsel %vm692_vm1, %v733_v38, -inf }
 0x28c   : > { %740 = vmax.xlane.f32.xlu0 %v739_v40  ;;  %v736_v41 = vpop.f32.mrb[6].mxu1 }
 0x28d   : > { %v1649_v42 = vpop.f32.mrb[7].mxu1 }
 0x319   : > { %v741_v43 = vpop.xlane.xlu0 %740 }
 0x31a   : > { %v742_v44 = vsub.f32 %v733_v38, %v741_v43 }
 0x31c   : > { %v743_v45 = vmul.f32 1.442695, %v742_v44 }
 0x31e   : > { %1829 = vpow2.f32 %v743_v45 }
 0x328   : > { %v1830_v46 = vpop.eup %1829 }
 0x329   : > { %v745_v47 = vsel %vm692_vm1, %v1830_v46, 0.0 }
 0x32a   : > { %746 = vadd.xlane.f32.xlu0 %v745_v47 }
 0x3b7   : > { %v747_v54 = vpop.xlane.xlu0 %746 }
 0x3b8   : > { %1831 = vrcp.f32 %v747_v54 }
 0x3c2   : > { %v1832_v55 = vpop.eup %1831 }
 0x3c3   : > { %v749_v56 = vmul.f32 %v1832_v55, %v1830_v46 }
 0x3c5   : > { %v750_v58 = vpack.c.bf16 %v749_v56, %v749_v56 }
 0x3c7   : > { %1653 = vmatmul.mubr.msk.bf16.vlgmr.msra.gmra.mrb[8].mxu1 %vm692_vm1, %v750_v58 }
 0x3c8   : > { %1657 = vmatpush3.bf16.xpose.msra.mxu1 %v810_v59  ;;  %1658 = vmatprep.mubr.msk.bf16.mxu1 %vm2077_vm0, %v2076_v0 }
 0x3c9   : > { %1662 = vmatprep.subr.bf16.mxu1 %v2076_v0 }
 0x3cf   : > { %1659 = vmatmul.mubr.msk.bf16.vlgmr.msra.gmra.mrb[12].mxu1 %vm692_vm1, %v802_v60 }
 0x3d0   : > { %1664 = vmatprep.mubr.msk.bf16.mxu1 %vm2077_vm0, %v2076_v0 }
 0x49a   : > { %v792_v61 = vpop.f32.mrb[8].mxu1 }
 0x49b   : > { %v1654_v62 = vpop.f32.mrb[9].mxu1  ;;  %v798_v24 = vpack.c.bf16 %v792_v61, %v792_v61 }
 0x49c   : > { %v795_v63 = vpop.f32.mrb[10].mxu1 }
 0x49d   : > { %v1655_v1 = vpop.f32.mrb[11].mxu1 }
 0x4a2   : > { %v846_v2 = vpop.f32.mrb[12].mxu1 }
 0x4a3   : > { %v1660_v3 = vpop.f32.mrb[13].mxu1  ;;  %v852_v4 = vsel %vm692_vm1, %v846_v2, -inf }
 0x4a4   : > { %853 = vmax.xlane.f32.xlu0 %v852_v4  ;;  %v849_v5 = vpop.f32.mrb[14].mxu1 }
 0x4a5   : > { %v1661_v6 = vpop.f32.mrb[15].mxu1 }
 0x4ba   : > { %865 = vrot.lane.b32.xlu0 %v2430_v51, %s2078_s30 }
 0x4be   : > { %1010 = vrot.lane.b32.xlu0 %v2403_v20, %s2079_s8 }
 0x4c2   : > { %1008 = vrot.lane.b32.xlu0 %v2409_v26, %s2079_s8 }
 0x531   : > { %v854_v7 = vpop.xlane.xlu0 %853 }
 0x532   : > { %v855_v8 = vsub.f32 %v846_v2, %v854_v7 }
 0x534   : > { %v856_v9 = vmul.f32 1.442695, %v855_v8 }
 0x535   : > { %v866_v10 = vpop.permute.xlu0 %865 }
 0x536   : > { %1833 = vpow2.f32 %v856_v9  ;;  %v871_v11 = vsel %vm754_vm2, %v866_v10, 0 }
 0x537   : > { %1663 = vmatpush3.bf16.msra.mxu1 %v871_v11 }
 0x538   : > { %1674 = vmatprep.subr.bf16.mxu1 %v2076_v0 }
 0x539   : > { %v1011_v27 = vpop.permute.xlu0 %1010 }
 0x53a   : > { %v1016_v32 = vsel %vm692_vm1, %v1011_v27, 0 }
 0x53d   : > { %v1009_v36 = vpop.permute.xlu0 %1008 }
 0x540   : > { %v1834_v12 = vpop.eup %1833 }
 0x541   : > { %v858_v13 = vsel %vm692_vm1, %v1834_v12, 0.0 }
 0x542   : > { %859 = vadd.xlane.f32.xlu1 %v858_v13 }
 0x553   : > { %1070 = vrot.lane.b32.xlu1 %v2430_v51, %s2079_s8 }
 0x5cf   : > { %v860_v16 = vpop.xlane.xlu1 %859 }
 0x5d0   : > { %1835 = vrcp.f32 %v860_v16  ;;  %v1285_v16 = vsel %vm754_vm2, %v1526_v15, 0 }
 0x5d3   : > { %v1071_v23 = vpop.permute.xlu1 %1070 }
 0x5d4   : > { %v1076_v25 = vsel %vm754_vm2, %v1071_v23, 0 }
 0x5da   : > { %v1836_v17 = vpop.eup %1835 }
 0x5db   : > { %v862_v19 = vmul.f32 %v1836_v17, %v1834_v12 }
 0x5dd   : > { %v863_v21 = vpack.c.bf16 %v862_v19, %v862_v19 }
 0x5df   : > { %1665 = vmatmul.mubr.msk.bf16.vlgmr.msra.gmra.mrb[16].mxu1 %vm692_vm1, %v863_v21 }
 0x5e0   : > { %1675 = vmatpush3.bf16.msra.mxu1 %v966_v22  ;;  %1676 = vmatprep.mubr.msk.bf16.mxu1 %vm2077_vm0, %v2076_v0 }
 0x5e1   : > { %1686 = vmatprep.subr.bf16.mxu1 %v2076_v0 }
 0x5e7   : > { %1677 = vmatmul.mubr.msk.bf16.vlgmr.msra.gmra.mrb[20].mxu1 %vm692_vm1, %v798_v24 }
 0x5e8   : > { %1687 = vmatpush3.bf16.msra.mxu1 %v1076_v25  ;;  %1688 = vmatprep.mubr.msk.bf16.mxu1 %vm2077_vm0, %v2076_v0 }
 0x5e9   : > { %1698 = vmatprep.subr.bf16.mxu1 %v2076_v0 }
 0x6b2   : > { %v907_v28 = vpop.f32.mrb[16].mxu1 }
 0x6b3   : > { %v913_v29 = vpack.c.bf16 %v907_v28, %v907_v28  ;;  %v1666_v30 = vpop.f32.mrb[17].mxu1 }
 0x6b4   : > { %v910_v31 = vpop.f32.mrb[18].mxu1 }
 0x6b5   : > { %v1667_v33 = vpop.f32.mrb[19].mxu1  ;;  %1671 = vmatmul.mubr.msk.bf16.vlgmr.msra.gmra.mrb[8].mxu0 %vm692_vm1, %v913_v29 }
 0x6b6   : > { %1681 = vmatpush3.bf16.xpose.msra.mxu0 %v1016_v32  ;;  %1682 = vmatprep.mubr.msk.bf16.mxu0 %vm2077_vm0, %v2076_v0  ;;  %v1528_v33 = vld [vmem:[%s2572_s6] ss:$0 sm:$0xff] }
 0x6b7   : > { %1692 = vmatprep.subr.bf16.mxu0 %v2076_v0 }
 0x6ba   : > { %v1002_v34 = vpop.f32.mrb[20].mxu1 }
 0x6bb   : > { %v1678_v35 = vpop.f32.mrb[21].mxu1 }
 0x6bc   : > { %v1005_v37 = vpop.f32.mrb[22].mxu1 }
 0x6bd   : > { %v1679_v38 = vpop.f32.mrb[23].mxu1  ;;  %1683 = vmatmul.mubr.msk.bf16.vlgmr.msra.gmra.mrb[12].mxu0 %vm692_vm1, %v1009_v36 }
 0x6be   : > { %1694 = vmatprep.mubr.msk.bf16.mxu0 %vm2077_vm0, %v2076_v0 }
 0x788   : > { %v956_v39 = vpop.f32.mrb[8].mxu0 }
 0x789   : > { %v2478_v40 = vadd.f32 %v1002_v34, %v956_v39  ;;  %v1672_v41 = vpop.f32.mrb[9].mxu0 }
 0x78a   : > { %v959_v42 = vpop.f32.mrb[10].mxu0 }
 0x78b   : > { %v1673_v43 = vpop.f32.mrb[11].mxu0 }
 0x790   : > { %v1052_v44 = vpop.f32.mrb[12].mxu0 }
 0x791   : > { %v1684_v45 = vpop.f32.mrb[13].mxu0  ;;  %v1058_v46 = vsel %vm692_vm1, %v1052_v44, -inf }
 0x792   : > { %1059 = vmax.xlane.f32.xlu0 %v1058_v46  ;;  %v1055_v47 = vpop.f32.mrb[14].mxu0 }
 0x793   : > { %v1685_v48 = vpop.f32.mrb[15].mxu0 }
 0x81f   : > { %v1060_v49 = vpop.xlane.xlu0 %1059 }
 0x820   : > { %v1061_v50 = vsub.f32 %v1052_v44, %v1060_v49 }
 0x822   : > { %v1062_v52 = vmul.f32 1.442695, %v1061_v50 }
 0x824   : > { %1837 = vpow2.f32 %v1062_v52 }
 0x82e   : > { %v1838_v53 = vpop.eup %1837 }
 0x82f   : > { %v1064_v54 = vsel %vm692_vm1, %v1838_v53, 0.0 }
 0x830   : > { %1065 = vadd.xlane.f32.xlu1 %v1064_v54 }
 0x841   : > { %1170 = vrot.lane.b32.xlu1 %v2403_v20, %s2080_s3 }
 0x845   : > { %1168 = vrot.lane.b32.xlu1 %v2409_v26, %s2080_s3  ;;  %v1522_v26 = vld [vmem:[%s2571_s5 + $0x8] sm:$0xf] }
 0x846   : > { %v1125_v61 = vsel %vm754_vm2, %v1522_v26, 0 }
 0x847   : > { %1693 = vmatpush3.bf16.msra.mxu0 %v1125_v61 }
 0x848   : > { %1704 = vmatprep.subr.bf16.mxu0 %v2076_v0 }
 0x8bd   : > { %v1066_v55 = vpop.xlane.xlu1 %1065 }
 0x8be   : > { %1839 = vrcp.f32 %v1066_v55 }
 0x8c1   : > { %v1171_v58 = vpop.permute.xlu1 %1170 }
 0x8c2   : > { %v1176_v60 = vsel %vm692_vm1, %v1171_v58, 0 }
 0x8c5   : > { %v1169_v20 = vpop.permute.xlu1 %1168 }
 0x8c8   : > { %v1840_v56 = vpop.eup %1839 }
 0x8c9   : > { %v1068_v57 = vmul.f32 %v1840_v56, %v1838_v53 }
 0x8cb   : > { %v1069_v59 = vpack.c.bf16 %v1068_v57, %v1068_v57 }
 0x8cd   : > { %1689 = vmatmul.mubr.msk.bf16.vlgmr.msra.gmra.mrb[24].mxu1 %vm692_vm1, %v1069_v59 }
 0x8ce   : > { %1699 = vmatpush3.bf16.xpose.msra.mxu1 %v1176_v60  ;;  %1700 = vmatprep.mubr.msk.bf16.mxu1 %vm2077_vm0, %v2076_v0 }
 0x8cf   : > { %1710 = vmatprep.subr.bf16.mxu1 %v2076_v0 }
 0x8d5   : > { %1701 = vmatmul.mubr.msk.bf16.vlgmr.msra.gmra.mrb[28].mxu1 %vm692_vm1, %v1169_v20 }
 0x8d6   : > { %1712 = vmatprep.mubr.msk.bf16.mxu1 %vm2077_vm0, %v2076_v0  ;;  %1711 = vmatpush3.bf16.msra.mxu1 %v1285_v16 }
 0x9a0   : > { %v1112_v62 = vpop.f32.mrb[24].mxu1 }
 0x9a1   : > { %v1118_v63 = vpack.c.bf16 %v1112_v62, %v1112_v62  ;;  %v1690_v1 = vpop.f32.mrb[25].mxu1 }
 0x9a2   : > { %v1115_v2 = vpop.f32.mrb[26].mxu1 }
 0x9a3   : > { %v1691_v3 = vpop.f32.mrb[27].mxu1  ;;  %1695 = vmatmul.mubr.msk.bf16.vlgmr.msra.gmra.mrb[16].mxu0 %vm692_vm1, %v1118_v63 }
 0x9a4   : > { %1706 = vmatprep.mubr.msk.bf16.mxu0 %vm2077_vm0, %v2076_v0 }
 0x9a8   : > { %v1212_v4 = vpop.f32.mrb[28].mxu1 }
 0x9a9   : > { %v1702_v5 = vpop.f32.mrb[29].mxu1  ;;  %v1218_v6 = vsel %vm692_vm1, %v1212_v4, -inf }
 0x9aa   : > { %1219 = vmax.xlane.f32.xlu0 %v1218_v6  ;;  %v1215_v7 = vpop.f32.mrb[30].mxu1 }
 0x9ab   : > { %v1703_v8 = vpop.f32.mrb[31].mxu1 }
 0x9c0   : > { %1230 = vrot.lane.b32.xlu0 %v2430_v51, %s2080_s3  ;;  %s1995_s3 = scalar_lea.vmem %s1994_s14, 256 }
 0x9c1   : > { %p1997_p8 = scmp.lt.s32.totalorder %s1995_s3, %s1989_s28 }
 0x9c3   : > { %p1998_p6 = por %p1997_p8, %p1996_p0 }
 0x9c5   : > { %p1999_p10 = pnand %p1998_p6, %p1992_p4 }
 0xa37   : > { %v1220_v9 = vpop.xlane.xlu0 %1219 }
 0xa38   : > { %v1221_v10 = vsub.f32 %v1212_v4, %v1220_v9 }
 0xa3a   : > { %v1222_v11 = vmul.f32 1.442695, %v1221_v10 }
 0xa3b   : > { %v1231_v12 = vpop.permute.xlu0 %1230 }
 0xa3c   : > { %1841 = vpow2.f32 %v1222_v11  ;;  %v1236_v13 = vsel %vm754_vm2, %v1231_v12, 0 }
 0xa3d   : > { %1705 = vmatpush3.bf16.msra.mxu0 %v1236_v13 }
 0xa46   : > { %v1842_v14 = vpop.eup %1841 }
 0xa47   : > { %v1224_v0 = vsel %vm692_vm1, %v1842_v14, 0.0 }
 0xa48   : > { %1225 = vadd.xlane.f32.xlu1 %v1224_v0 }
 0xa76   : > { %v1161_v51 = vpop.f32.mrb[16].mxu0 }
 0xa77   : > { %v1167_v17 = vadd.f32 %v1161_v51, %v2478_v40  ;;  %v1696_v18 = vpop.f32.mrb[17].mxu0 }
 0xa78   : > { %v1164_v19 = vpop.f32.mrb[18].mxu0 }
 0xa79   : > { %v1697_v21 = vpop.f32.mrb[19].mxu0 }
 0xad5   : > { %v1226_v22 = vpop.xlane.xlu1 %1225 }
 0xad6   : > { %1843 = vrcp.f32 %v1226_v22 }
 0xae0   : > { %v1844_v23 = vpop.eup %1843 }
 0xae1   : > { %v1228_v24 = vmul.f32 %v1844_v23, %v1842_v14 }
 0xae3   : > { %v1229_v25 = vpack.c.bf16 %v1228_v24, %v1228_v24 }
 0xae5   : > { %1707 = vmatmul.mubr.msk.bf16.vlgmr.msra.gmra.mrb[20].mxu0 %vm692_vm1, %v1229_v25 }
 0xbb8   : > { %v1272_v27 = vpop.f32.mrb[20].mxu0 }
 0xbb9   : > { %v1278_v28 = vpack.c.bf16 %v1272_v27, %v1272_v27  ;;  %v1708_v29 = vpop.f32.mrb[21].mxu0 }
 0xbba   : > { %v1275_v30 = vpop.f32.mrb[22].mxu0 }
 0xbbb   : > { %v1709_v31 = vpop.f32.mrb[23].mxu0  ;;  %1713 = vmatmul.mubr.msk.bf16.vlgmr.msra.gmra.mrb[32].mxu1 %vm692_vm1, %v1278_v28 }
 0xc8e   : > { %v1321_v32 = vpop.f32.mrb[32].mxu1 }
 0xc8f   : > { %v1327_v34 = vadd.f32 %v1321_v32, %v1167_v17  ;;  %v1714_v35 = vpop.f32.mrb[33].mxu1 }
 0xc90   : > { %v1324_v36 = vpop.f32.mrb[34].mxu1 }
 0xc91   : > { %v1335_v37 = vadd.f32 %v1528_v33, %v1327_v34  ;;  %v1715_v38 = vpop.f32.mrb[35].mxu1 }
 0xc93   : > { %1336 = vst [vmem:[%s373_s9] sm:$0xff] %v1335_v37 }
 0xc94   : > { %2002 = shalt.err (!%p1999_p10)
}
 0xc95   : > { %s2003_s2 = scalar_lea.hbm %s2522_s13, 128  ;;  %s2007_s10 = scalar_lea.hbm %s2573_s7, 256 }
 0xc96   : > { %p2004_p13 = scmp.ne.s32.totalorder %s2522_s13, %s2003_s2  ;;  %p2008_p9 = scmp.lt.u32.totalorder %s2522_s13, %s2573_s7 }
 0xc97   : > { %p2009_p3 = scmp.lt.u32.totalorder %s2007_s10, %s2003_s2  ;;  %p2011_p12 = scmp.lt.u32.totalorder %s2003_s2, %s2522_s13 }
 0xc98   : > { %p2005_p5 = pnand %p2004_p13, %p2600_p1 }
 0xc99   : > { %p2010_p7 = por %p2009_p3, %p2008_p9 }
 0xc9a   : > { %p2006_p11 = pneg %p2005_p5 }
 0xc9b   : > { %p2012_p2 = por %p2011_p12, %p2010_p7 }
 0xc9d   : > { %p2013_p4 = pnand %p2012_p2, %p2006_p11 }
 0xc9f   : > { %2016 = shalt.err (!%p2013_p4)
}
 0xca0   : > { %1732 = dma.vmem_to_hbm [thread:$0]  (%p2600_p1), %s2524_s12, 128, %s2522_s13, %s1338_s20  }
 0xca1 PF: > { %s2601_s15 = sld [smem:[#allocation17_spill]]  ;;  %s1363_s29 = sand.u32 1, %s2055_s24  }
 0xca2   : > { %p2603_p8 = scmp.ge.s32.totalorder %s2067_s27, 2  ;;  %s1364_s11 = scalar_lea.sflag [#allocation4], %s1363_s29 }
 0xca7   : > { %p2602_p0 = scmp.ne.s32.totalorder %s2601_s15, 0 }
 0xca9   : > { %p1752_p6 = pnand %p2603_p8, %p2602_p0 }
 0xcab   : > { %2050 = dma.done.wait (!%p1752_p6), %s1364_s11, 128  }
 0xcac   : > { %2052 = vsyncadd (!%p1752_p6), %s1364_s11, 4294967168  ;;  %p24_p10 = scmp.ge.s32.totalorder %s2262_s22, 4   ;;  %s2604_s24 = smov %s2059_s25 }
 0xcad   : > { %s2605_s25 = smov %s2063_s26  ;;  %s2606_s26 = smov %s2272_s18 }
 0xcae   : > { %s2607_s27 = smov %s2262_s22  ;;  %26 = sbr.rel (!%p24_p10) target bundleno = 12 (0xc), region = 121 }
 0xcb5   :  { %1369 = vsyncpa [#allocation3], 1 }
 0xcb6   :  { %1371 = vsyncpa [#allocation3 + $0x1], 1 }
 0xcb7   :  { %1372 = vsyncpa [#allocation6], 1 }
 0xcb8   :  { %1374 = vsyncpa [#allocation6 + $0x1], 1 }
 0xcb9   :  { %1375 = vsyncpa [#allocation9], 1 }
 0xcba   :  { %1376 = vsyncpa [#allocation4], 1 }
 0xcbb   :  { %1378 = vsyncpa [#allocation4 + $0x1], 1 }

</bundles_post_ra>
